<compile_context>
chip_gen: v5e
topology: v5e:2x2
jax: 0.10.0
libtpu: 0.0.40
codegen_flags: <defaults>
</compile_context>

<pallas_src>
import math

import jax
import jax.numpy as jnp
from jax import lax
from jax.experimental import pallas as pl
from jax.experimental.pallas import tpu as pltpu


def _make_flash_kernel(heads_per_block: int, head_dim: int, scale: float,
                       mm_dtype, approx_recip: bool):
    """Kernel for one (batch, head-group, q-tile, kv-tile) grid point.

    Blocks: q/o (1, Tq, W), k/v (1, Tk, W) with W = heads_per_block * head_dim.
    Scratch: m/l (G, Tq, 1) f32, acc (G, Tq, h) f32, persistent across the
    innermost KV grid axis (output block constant along it).
    """
    G, h = heads_per_block, head_dim

    def kernel(q_ref, k_ref, v_ref, o_ref, m_sc, l_sc, acc_sc):
        ki = pl.program_id(3)

        @pl.when(ki == 0)
        def _():
            m_sc[...] = jnp.full_like(m_sc, -jnp.inf)
            l_sc[...] = jnp.zeros_like(l_sc)
            acc_sc[...] = jnp.zeros_like(acc_sc)

        q = q_ref[0]          # (Tq, W)
        k = k_ref[0]          # (Tk, W)
        v = v_ref[0]          # (Tk, W)

        for n in range(G):    # static unroll, G <= 16
            lo = n * h
            hi = lo + h
            qh = q[:, lo:hi] * scale          # softmax scale folded into Q
            kh = k[:, lo:hi]
            vh = v[:, lo:hi]
            if mm_dtype is not None:
                qh = qh.astype(mm_dtype)
                kh = kh.astype(mm_dtype)
                vh = vh.astype(mm_dtype)

            # Scores for this (q-tile, kv-tile): contract last dims (no k.T).
            s = lax.dot_general(qh, kh, (((1,), (1,)), ((), ())),
                                preferred_element_type=jnp.float32)  # (Tq, Tk)

            m_prev = m_sc[n]                                          # (Tq, 1)
            m_new = jnp.maximum(m_prev, jnp.max(s, axis=-1, keepdims=True))
            alpha = jnp.exp(m_prev - m_new)
            p = jnp.exp(s - m_new)
            # TODO(synk): with bf16 MXU operands on v6e/v7x a packed-bf16 exp
            # here would ~double EUP throughput (not applicable on v5e).
            l_sc[n] = alpha * l_sc[n] + jnp.sum(p, axis=-1, keepdims=True)
            acc_sc[n] = alpha * acc_sc[n] + jnp.dot(
                p.astype(vh.dtype), vh, preferred_element_type=jnp.float32)
            m_sc[n] = m_new

        @pl.when(ki == pl.num_programs(3) - 1)
        def _():
            for n in range(G):
                lo = n * h
                if approx_recip:
                    out = acc_sc[n] * pl.reciprocal(l_sc[n], approx=True)
                else:
                    out = acc_sc[n] / l_sc[n]          # exact normalization
                o_ref[0, :, lo:lo + h] = out.astype(o_ref.dtype)

    return kernel


def _pick_tile(size: int, max_tile: int) -> int:
    """Largest multiple-of-8 divisor of `size` that is <= max_tile, else size."""
    if size <= max_tile:
        return size
    for t in range(min(max_tile, size), 7, -1):
        if size % t == 0 and t % 8 == 0:
            return t
    # TODO(synk): pad/mask ragged sequence lengths instead of falling back to a
    # full-S block (a large prime S would otherwise blow the VMEM budget).
    return size


def _vmem_limit_bytes() -> int:
    """Per-chip scoped-VMEM budget: 3/4 of physical VMEM, capped at 110 MiB.

    ~48 MiB on v7x (64 MiB physical), ~96 MiB on v5e/v6e (128 MiB physical);
    leaves headroom for Mosaic internal scratch and spills.
    """
    try:
        cap = int(pltpu.get_tpu_info().vmem_capacity_bytes)
    except Exception:  # conservative fallback if the query is unavailable
        cap = 64 * 1024 * 1024
    return int(min(cap * 3 // 4, 110 * 1024 * 1024))


def qkv_attention_trt_fused_mha(Q: jax.Array, K: jax.Array, V: jax.Array,
                                n_heads: int = 1, *,
                                matmul_dtype="auto",
                                q_tile: int = 256, kv_tile: int = 512,
                                approx_reciprocal: bool = False) -> jax.Array:
    """Matches QKVAttentionMatchTensorRTfusedMHA.forward.

    Q, K, V: [B, S, H] arrays.  Returns [B, S, H].
    matmul_dtype: "auto" (bf16 MXU operands for f32 inputs), a dtype, or None.
    q_tile / kv_tile: max rows per q / kv block (caps the live (Tq, Tk) scores).
    approx_reciprocal: use the EUP approximate reciprocal for the final softmax
      normalization (slightly faster, ~1e-4 relative error).
    """
    B, S, H = Q.shape
    N = n_heads
    assert H % N == 0, "H must be divisible by n_heads"
    h = H // N
    scale = 1.0 / math.sqrt(h)

    if matmul_dtype == "auto":
        mm_dtype = jnp.bfloat16 if Q.dtype == jnp.float32 else None
    else:
        mm_dtype = matmul_dtype

    # Head grouping so every block is lane-dense (width multiple of 128 or
    # equal to the full H dimension).
    if h % 128 == 0:
        G, W = 1, h                       # one head per block
    elif (128 % h == 0) and (H % 128 == 0):
        G, W = 128 // h, 128              # g heads share one 128-lane block
    else:
        G, W = N, H                       # toy-shape fallback: full-H block
    NG = H // W                           # number of head-groups along H

    Tq = _pick_tile(S, q_tile)
    Tk = _pick_tile(S, kv_tile)
    n_q = S // Tq
    n_kv = S // Tk

    grid = (B, NG, n_q, n_kv)
    q_spec = pl.BlockSpec((1, Tq, W), lambda b, n, qi, ki: (b, qi, n))
    kv_spec = pl.BlockSpec((1, Tk, W), lambda b, n, qi, ki: (b, ki, n))
    o_spec = pl.BlockSpec((1, Tq, W), lambda b, n, qi, ki: (b, qi, n))

    kernel = _make_flash_kernel(G, h, scale, mm_dtype, approx_reciprocal)

    itemsize = jnp.dtype(Q.dtype).itemsize
    cost = pl.CostEstimate(
        flops=int(4 * B * N * S * S * h),
        transcendentals=int(B * N * S * S),
        bytes_accessed=int(itemsize * B * S * H * (2 + 2 * n_q)),
    )

    return pl.pallas_call(
        kernel,
        out_shape=jax.ShapeDtypeStruct((B, S, H), Q.dtype),
        grid_spec=pltpu.PrefetchScalarGridSpec(
            num_scalar_prefetch=0,
            grid=grid,
            in_specs=[q_spec, kv_spec, kv_spec],
            out_specs=o_spec,
            scratch_shapes=[
                pltpu.VMEM((G, Tq, 1), jnp.float32),   # running max m
                pltpu.VMEM((G, Tq, 1), jnp.float32),   # running sum l
                pltpu.VMEM((G, Tq, h), jnp.float32),   # output accumulator
            ],
        ),
        compiler_params=pltpu.CompilerParams(
            # B / head-group lead as parallel axes (megacore shards there on
            # v7x, so K/V stream once per core); KV reduction axis last.
            dimension_semantics=("parallel", "parallel", "parallel", "arbitrary"),
            vmem_limit_bytes=_vmem_limit_bytes(),
        ),
        cost_estimate=cost,
    )(Q, K, V)


def _reference(Q, K, V, n_heads):
    B, S, H = Q.shape
    N = n_heads
    h = H // N
    q = jnp.transpose(Q.reshape(B, S, N, h), (0, 2, 1, 3))
    k = jnp.transpose(K.reshape(B, S, N, h), (0, 2, 3, 1))
    v = jnp.transpose(V.reshape(B, S, N, h), (0, 2, 1, 3))
    w = jnp.matmul(q, k) * (1.0 / math.sqrt(h))
    w = jax.nn.softmax(w, axis=-1)
    o = jnp.matmul(w, v)
    return jnp.transpose(o, (0, 2, 1, 3)).reshape(B, S, H)


if __name__ == "__main__":
    root = jax.random.PRNGKey(0)
    ks = jax.random.split(root, 9)

    TOL_F32 = 1e-2    # f32 MXU operands (default TPU matmul precision)
    TOL_BF16 = 5e-2   # bf16 MXU operands

    # Case 1: toy shapes (h = 8, H < 128) -> full-H fallback block, 1 KV tile.
    B, S, H, N = 2, 8, 32, 4
    Q = jax.random.normal(ks[0], (B, S, H), dtype=jnp.float32)
    K = jax.random.normal(ks[1], (B, S, H), dtype=jnp.float32)
    V = jax.random.normal(ks[2], (B, S, H), dtype=jnp.float32)
    out = jax.block_until_ready(
        qkv_attention_trt_fused_mha(Q, K, V, n_heads=N, matmul_dtype=None))
    ref = _reference(Q, K, V, N)
    assert out.shape == (B, S, H)
    assert jnp.allclose(out, ref, atol=TOL_F32, rtol=TOL_F32), "case1 mismatch"

    # Case 2: h = 128 -> per-head path, tiled over both q and kv axes.
    B2, S2, H2, N2 = 2, 128, 256, 2
    Q2 = jax.random.normal(ks[3], (B2, S2, H2), dtype=jnp.float32)
    K2 = jax.random.normal(ks[4], (B2, S2, H2), dtype=jnp.float32)
    V2 = jax.random.normal(ks[5], (B2, S2, H2), dtype=jnp.float32)
    out2 = jax.block_until_ready(
        qkv_attention_trt_fused_mha(Q2, K2, V2, n_heads=N2, matmul_dtype=None,
                                    q_tile=64, kv_tile=64))
    ref2 = _reference(Q2, K2, V2, N2)
    assert out2.shape == (B2, S2, H2)
    assert jnp.allclose(out2, ref2, atol=TOL_F32, rtol=TOL_F32), "case2 mismatch"

    # Case 3: h = 64 -> 2 heads per 128-lane block, online softmax across 4 KV
    # tiles, default bf16 MXU operands, exact final normalization.
    B3, S3, H3, N3 = 2, 256, 256, 4
    Q3 = jax.random.normal(ks[6], (B3, S3, H3), dtype=jnp.float32)
    K3 = jax.random.normal(ks[7], (B3, S3, H3), dtype=jnp.float32)
    V3 = jax.random.normal(ks[8], (B3, S3, H3), dtype=jnp.float32)
    out3 = jax.block_until_ready(
        qkv_attention_trt_fused_mha(Q3, K3, V3, n_heads=N3,
                                    q_tile=128, kv_tile=64))
    ref3 = _reference(Q3, K3, V3, N3)
    assert out3.shape == (B3, S3, H3)
    assert jnp.allclose(out3, ref3, atol=TOL_BF16, rtol=TOL_BF16), "case3 mismatch"

    print("KERNEL_OK")
</pallas_src>

<mosaic_0001>
module attributes {stable_mosaic.version = 11 : i64} {
  func.func @kernel(%arg0: i32, %arg1: i32, %arg2: i32, %arg3: i32, %arg4: memref<1x8x32xf32, #tpu.memory_space<vmem>>, %arg5: memref<1x8x32xf32, #tpu.memory_space<vmem>>, %arg6: memref<1x8x32xf32, #tpu.memory_space<vmem>>, %arg7: memref<1x8x32xf32, #tpu.memory_space<vmem>>, %arg8: memref<4x8x1xf32, #tpu.memory_space<vmem>>, %arg9: memref<4x8x1xf32, #tpu.memory_space<vmem>>, %arg10: memref<4x8x8xf32, #tpu.memory_space<vmem>>) attributes {dimension_semantics = [#tpu.dimension_semantics<parallel>, #tpu.dimension_semantics<parallel>, #tpu.dimension_semantics<parallel>, #tpu.dimension_semantics<arbitrary>], iteration_bounds = array<i64: 2, 1, 1, 1>, scalar_prefetch = 0 : i64, scratch_operands = 3 : i64, tpu.core_type = #tpu.core_type<tc>, window_params = [{transform_indices = @transform_0, window_bounds = array<i64: 1, 8, 32>}, {transform_indices = @transform_1, window_bounds = array<i64: 1, 8, 32>}, {transform_indices = @transform_2, window_bounds = array<i64: 1, 8, 32>}, {transform_indices = @transform_3, window_bounds = array<i64: 1, 8, 32>}]} {
    %c0_i32 = arith.constant 0 : i32
    %0 = arith.cmpi eq, %arg3, %c0_i32 : i32
    %1 = arith.extui %0 : i1 to i32
    %c0_i32_0 = arith.constant 0 : i32
    %2 = arith.cmpi ne, %1, %c0_i32_0 : i32
    scf.if %2 {
      %cst_99 = arith.constant 0xFF800000 : f32
      %160 = vector.broadcast %cst_99 : f32 to vector<4x8x1xf32>
      %c0_100 = arith.constant 0 : index
      %c0_101 = arith.constant 0 : index
      %c0_102 = arith.constant 0 : index
      %161 = vector.load %arg8[%c0_100, %c0_101, %c0_102] : memref<4x8x1xf32, #tpu.memory_space<vmem>>, vector<4x8x1xf32>
      tpu.vector_store %arg8[%c0_100, %c0_101, %c0_102], %160 {strides = array<i32>} : memref<4x8x1xf32, #tpu.memory_space<vmem>>, vector<4x8x1xf32>,
      %cst_103 = arith.constant 0.000000e+00 : f32
      %162 = vector.broadcast %cst_103 : f32 to vector<4x8x1xf32>
      %c0_104 = arith.constant 0 : index
      %c0_105 = arith.constant 0 : index
      %c0_106 = arith.constant 0 : index
      %163 = vector.load %arg9[%c0_104, %c0_105, %c0_106] : memref<4x8x1xf32, #tpu.memory_space<vmem>>, vector<4x8x1xf32>
      tpu.vector_store %arg9[%c0_104, %c0_105, %c0_106], %162 {strides = array<i32>} : memref<4x8x1xf32, #tpu.memory_space<vmem>>, vector<4x8x1xf32>,
      %cst_107 = arith.constant 0.000000e+00 : f32
      %164 = vector.broadcast %cst_107 : f32 to vector<4x8x8xf32>
      %c0_108 = arith.constant 0 : index
      %c0_109 = arith.constant 0 : index
      %c0_110 = arith.constant 0 : index
      %165 = vector.load %arg10[%c0_108, %c0_109, %c0_110] : memref<4x8x8xf32, #tpu.memory_space<vmem>>, vector<4x8x8xf32>
      tpu.vector_store %arg10[%c0_108, %c0_109, %c0_110], %164 {strides = array<i32>} : memref<4x8x8xf32, #tpu.memory_space<vmem>>, vector<4x8x8xf32>,
    } else {
    }
    %c0 = arith.constant 0 : index
    %c0_1 = arith.constant 0 : index
    %c0_2 = arith.constant 0 : index
    %3 = vector.load %arg4[%c0, %c0_1, %c0_2] : memref<1x8x32xf32, #tpu.memory_space<vmem>>, vector<1x8x32xf32>
    %4 = vector.shape_cast %3 : vector<1x8x32xf32> to vector<8x32xf32>
    %c0_3 = arith.constant 0 : index
    %c0_4 = arith.constant 0 : index
    %c0_5 = arith.constant 0 : index
    %5 = vector.load %arg5[%c0_3, %c0_4, %c0_5] : memref<1x8x32xf32, #tpu.memory_space<vmem>>, vector<1x8x32xf32>
    %6 = vector.shape_cast %5 : vector<1x8x32xf32> to vector<8x32xf32>
    %c0_6 = arith.constant 0 : index
    %c0_7 = arith.constant 0 : index
    %c0_8 = arith.constant 0 : index
    %7 = vector.load %arg6[%c0_6, %c0_7, %c0_8] : memref<1x8x32xf32, #tpu.memory_space<vmem>>, vector<1x8x32xf32>
    %8 = vector.shape_cast %7 : vector<1x8x32xf32> to vector<8x32xf32>
    %9 = vector.extract_strided_slice %4 {offsets = [0, 0], sizes = [8, 8], strides = [1, 1]} : vector<8x32xf32> to vector<8x8xf32>
    %cst = arith.constant 0.353553385 : f32
    %10 = vector.broadcast %cst : f32 to vector<8x8xf32>
    %11 = arith.mulf %9, %10 : vector<8x8xf32>
    %12 = vector.extract_strided_slice %6 {offsets = [0, 0], sizes = [8, 8], strides = [1, 1]} : vector<8x32xf32> to vector<8x8xf32>
    %13 = vector.extract_strided_slice %8 {offsets = [0, 0], sizes = [8, 8], strides = [1, 1]} : vector<8x32xf32> to vector<8x8xf32>
    %cst_9 = arith.constant dense<0.000000e+00> : vector<8x8xf32>
    %14 = tpu.matmul %11, %12, %cst_9 {dimension_numbers = #tpu.dot_dimension_numbers<[1], [1], [0], [0], [0, 0, 1, 0], [], []>} : vector<8x8xf32>, vector<8x8xf32>, vector<8x8xf32> -> vector<8x8xf32>
    %c0_10 = arith.constant 0 : index
    %c0_11 = arith.constant 0 : index
    %c0_12 = arith.constant 0 : index
    %15 = vector.load %arg8[%c0_10, %c0_11, %c0_12] : memref<4x8x1xf32, #tpu.memory_space<vmem>>, vector<1x8x1xf32>
    %16 = vector.shape_cast %15 : vector<1x8x1xf32> to vector<8x1xf32>
    %cst_13 = arith.constant dense<0xFF800000> : vector<8xf32>
    %17 = vector.multi_reduction <maximumf>, %14, %cst_13 [1] : vector<8x8xf32> to vector<8xf32>
    %18 = vector.shape_cast %17 : vector<8xf32> to vector<8x1xf32>
    %19 = arith.maximumf %16, %18 : vector<8x1xf32>
    %20 = arith.subf %16, %19 : vector<8x1xf32>
    %21 = math.exp %20 : vector<8x1xf32>
    %22 = vector.broadcast %19 : vector<8x1xf32> to vector<8x8xf32>
    %23 = arith.subf %14, %22 : vector<8x8xf32>
    %24 = math.exp %23 : vector<8x8xf32>
    %c0_14 = arith.constant 0 : index
    %c0_15 = arith.constant 0 : index
    %c0_16 = arith.constant 0 : index
    %25 = vector.load %arg9[%c0_14, %c0_15, %c0_16] : memref<4x8x1xf32, #tpu.memory_space<vmem>>, vector<1x8x1xf32>
    %26 = vector.shape_cast %25 : vector<1x8x1xf32> to vector<8x1xf32>
    %27 = arith.mulf %21, %26 : vector<8x1xf32>
    %cst_17 = arith.constant dense<0.000000e+00> : vector<8xf32>
    %28 = vector.multi_reduction <add>, %24, %cst_17 [1] : vector<8x8xf32> to vector<8xf32>
    %29 = vector.shape_cast %28 : vector<8xf32> to vector<8x1xf32>
    %30 = arith.addf %27, %29 : vector<8x1xf32>
    %c0_18 = arith.constant 0 : index
    %c0_19 = arith.constant 0 : index
    %c0_20 = arith.constant 0 : index
    %31 = vector.load %arg9[%c0_18, %c0_19, %c0_20] : memref<4x8x1xf32, #tpu.memory_space<vmem>>, vector<1x8x1xf32>
    %32 = vector.shape_cast %31 : vector<1x8x1xf32> to vector<8x1xf32>
    %33 = vector.shape_cast %30 : vector<8x1xf32> to vector<1x8x1xf32>
    tpu.vector_store %arg9[%c0_18, %c0_19, %c0_20], %33 {strides = array<i32>} : memref<4x8x1xf32, #tpu.memory_space<vmem>>, vector<1x8x1xf32>,
    %c0_21 = arith.constant 0 : index
    %c0_22 = arith.constant 0 : index
    %c0_23 = arith.constant 0 : index
    %34 = vector.load %arg10[%c0_21, %c0_22, %c0_23] : memref<4x8x8xf32, #tpu.memory_space<vmem>>, vector<1x8x8xf32>
    %35 = vector.shape_cast %34 : vector<1x8x8xf32> to vector<8x8xf32>
    %36 = vector.broadcast %21 : vector<8x1xf32> to vector<8x8xf32>
    %37 = arith.mulf %36, %35 : vector<8x8xf32>
    %cst_24 = arith.constant dense<0.000000e+00> : vector<8x8xf32>
    %38 = tpu.matmul %24, %13, %cst_24 {dimension_numbers = #tpu.dot_dimension_numbers<[1], [0], [0], [1], [0, 0, 1, 1], [], []>} : vector<8x8xf32>, vector<8x8xf32>, vector<8x8xf32> -> vector<8x8xf32>
    %39 = arith.addf %37, %38 : vector<8x8xf32>
    %c0_25 = arith.constant 0 : index
    %c0_26 = arith.constant 0 : index
    %c0_27 = arith.constant 0 : index
    %40 = vector.load %arg10[%c0_25, %c0_26, %c0_27] : memref<4x8x8xf32, #tpu.memory_space<vmem>>, vector<1x8x8xf32>
    %41 = vector.shape_cast %40 : vector<1x8x8xf32> to vector<8x8xf32>
    %42 = vector.shape_cast %39 : vector<8x8xf32> to vector<1x8x8xf32>
    tpu.vector_store %arg10[%c0_25, %c0_26, %c0_27], %42 {strides = array<i32>} : memref<4x8x8xf32, #tpu.memory_space<vmem>>, vector<1x8x8xf32>,
    %c0_28 = arith.constant 0 : index
    %c0_29 = arith.constant 0 : index
    %c0_30 = arith.constant 0 : index
    %43 = vector.load %arg8[%c0_28, %c0_29, %c0_30] : memref<4x8x1xf32, #tpu.memory_space<vmem>>, vector<1x8x1xf32>
    %44 = vector.shape_cast %43 : vector<1x8x1xf32> to vector<8x1xf32>
    %45 = vector.shape_cast %19 : vector<8x1xf32> to vector<1x8x1xf32>
    tpu.vector_store %arg8[%c0_28, %c0_29, %c0_30], %45 {strides = array<i32>} : memref<4x8x1xf32, #tpu.memory_space<vmem>>, vector<1x8x1xf32>,
    %46 = vector.extract_strided_slice %4 {offsets = [0, 8], sizes = [8, 8], strides = [1, 1]} : vector<8x32xf32> to vector<8x8xf32>
    %cst_31 = arith.constant 0.353553385 : f32
    %47 = vector.broadcast %cst_31 : f32 to vector<8x8xf32>
    %48 = arith.mulf %46, %47 : vector<8x8xf32>
    %49 = vector.extract_strided_slice %6 {offsets = [0, 8], sizes = [8, 8], strides = [1, 1]} : vector<8x32xf32> to vector<8x8xf32>
    %50 = vector.extract_strided_slice %8 {offsets = [0, 8], sizes = [8, 8], strides = [1, 1]} : vector<8x32xf32> to vector<8x8xf32>
    %cst_32 = arith.constant dense<0.000000e+00> : vector<8x8xf32>
    %51 = tpu.matmul %48, %49, %cst_32 {dimension_numbers = #tpu.dot_dimension_numbers<[1], [1], [0], [0], [0, 0, 1, 0], [], []>} : vector<8x8xf32>, vector<8x8xf32>, vector<8x8xf32> -> vector<8x8xf32>
    %c1 = arith.constant 1 : index
    %c0_33 = arith.constant 0 : index
    %c0_34 = arith.constant 0 : index
    %52 = vector.load %arg8[%c1, %c0_33, %c0_34] : memref<4x8x1xf32, #tpu.memory_space<vmem>>, vector<1x8x1xf32>
    %53 = vector.shape_cast %52 : vector<1x8x1xf32> to vector<8x1xf32>
    %cst_35 = arith.constant dense<0xFF800000> : vector<8xf32>
    %54 = vector.multi_reduction <maximumf>, %51, %cst_35 [1] : vector<8x8xf32> to vector<8xf32>
    %55 = vector.shape_cast %54 : vector<8xf32> to vector<8x1xf32>
    %56 = arith.maximumf %53, %55 : vector<8x1xf32>
    %57 = arith.subf %53, %56 : vector<8x1xf32>
    %58 = math.exp %57 : vector<8x1xf32>
    %59 = vector.broadcast %56 : vector<8x1xf32> to vector<8x8xf32>
    %60 = arith.subf %51, %59 : vector<8x8xf32>
    %61 = math.exp %60 : vector<8x8xf32>
    %c1_36 = arith.constant 1 : index
    %c0_37 = arith.constant 0 : index
    %c0_38 = arith.constant 0 : index
    %62 = vector.load %arg9[%c1_36, %c0_37, %c0_38] : memref<4x8x1xf32, #tpu.memory_space<vmem>>, vector<1x8x1xf32>
    %63 = vector.shape_cast %62 : vector<1x8x1xf32> to vector<8x1xf32>
    %64 = arith.mulf %58, %63 : vector<8x1xf32>
    %cst_39 = arith.constant dense<0.000000e+00> : vector<8xf32>
    %65 = vector.multi_reduction <add>, %61, %cst_39 [1] : vector<8x8xf32> to vector<8xf32>
    %66 = vector.shape_cast %65 : vector<8xf32> to vector<8x1xf32>
    %67 = arith.addf %64, %66 : vector<8x1xf32>
    %c1_40 = arith.constant 1 : index
    %c0_41 = arith.constant 0 : index
    %c0_42 = arith.constant 0 : index
    %68 = vector.load %arg9[%c1_40, %c0_41, %c0_42] : memref<4x8x1xf32, #tpu.memory_space<vmem>>, vector<1x8x1xf32>
    %69 = vector.shape_cast %68 : vector<1x8x1xf32> to vector<8x1xf32>
    %70 = vector.shape_cast %67 : vector<8x1xf32> to vector<1x8x1xf32>
    tpu.vector_store %arg9[%c1_40, %c0_41, %c0_42], %70 {strides = array<i32>} : memref<4x8x1xf32, #tpu.memory_space<vmem>>, vector<1x8x1xf32>,
    %c1_43 = arith.constant 1 : index
    %c0_44 = arith.constant 0 : index
    %c0_45 = arith.constant 0 : index
    %71 = vector.load %arg10[%c1_43, %c0_44, %c0_45] : memref<4x8x8xf32, #tpu.memory_space<vmem>>, vector<1x8x8xf32>
    %72 = vector.shape_cast %71 : vector<1x8x8xf32> to vector<8x8xf32>
    %73 = vector.broadcast %58 : vector<8x1xf32> to vector<8x8xf32>
    %74 = arith.mulf %73, %72 : vector<8x8xf32>
    %cst_46 = arith.constant dense<0.000000e+00> : vector<8x8xf32>
    %75 = tpu.matmul %61, %50, %cst_46 {dimension_numbers = #tpu.dot_dimension_numbers<[1], [0], [0], [1], [0, 0, 1, 1], [], []>} : vector<8x8xf32>, vector<8x8xf32>, vector<8x8xf32> -> vector<8x8xf32>
    %76 = arith.addf %74, %75 : vector<8x8xf32>
    %c1_47 = arith.constant 1 : index
    %c0_48 = arith.constant 0 : index
    %c0_49 = arith.constant 0 : index
    %77 = vector.load %arg10[%c1_47, %c0_48, %c0_49] : memref<4x8x8xf32, #tpu.memory_space<vmem>>, vector<1x8x8xf32>
    %78 = vector.shape_cast %77 : vector<1x8x8xf32> to vector<8x8xf32>
    %79 = vector.shape_cast %76 : vector<8x8xf32> to vector<1x8x8xf32>
    tpu.vector_store %arg10[%c1_47, %c0_48, %c0_49], %79 {strides = array<i32>} : memref<4x8x8xf32, #tpu.memory_space<vmem>>, vector<1x8x8xf32>,
    %c1_50 = arith.constant 1 : index
    %c0_51 = arith.constant 0 : index
    %c0_52 = arith.constant 0 : index
    %80 = vector.load %arg8[%c1_50, %c0_51, %c0_52] : memref<4x8x1xf32, #tpu.memory_space<vmem>>, vector<1x8x1xf32>
    %81 = vector.shape_cast %80 : vector<1x8x1xf32> to vector<8x1xf32>
    %82 = vector.shape_cast %56 : vector<8x1xf32> to vector<1x8x1xf32>
    tpu.vector_store %arg8[%c1_50, %c0_51, %c0_52], %82 {strides = array<i32>} : memref<4x8x1xf32, #tpu.memory_space<vmem>>, vector<1x8x1xf32>,
    %83 = vector.extract_strided_slice %4 {offsets = [0, 16], sizes = [8, 8], strides = [1, 1]} : vector<8x32xf32> to vector<8x8xf32>
    %cst_53 = arith.constant 0.353553385 : f32
    %84 = vector.broadcast %cst_53 : f32 to vector<8x8xf32>
    %85 = arith.mulf %83, %84 : vector<8x8xf32>
    %86 = vector.extract_strided_slice %6 {offsets = [0, 16], sizes = [8, 8], strides = [1, 1]} : vector<8x32xf32> to vector<8x8xf32>
    %87 = vector.extract_strided_slice %8 {offsets = [0, 16], sizes = [8, 8], strides = [1, 1]} : vector<8x32xf32> to vector<8x8xf32>
    %cst_54 = arith.constant dense<0.000000e+00> : vector<8x8xf32>
    %88 = tpu.matmul %85, %86, %cst_54 {dimension_numbers = #tpu.dot_dimension_numbers<[1], [1], [0], [0], [0, 0, 1, 0], [], []>} : vector<8x8xf32>, vector<8x8xf32>, vector<8x8xf32> -> vector<8x8xf32>
    %c2 = arith.constant 2 : index
    %c0_55 = arith.constant 0 : index
    %c0_56 = arith.constant 0 : index
    %89 = vector.load %arg8[%c2, %c0_55, %c0_56] : memref<4x8x1xf32, #tpu.memory_space<vmem>>, vector<1x8x1xf32>
    %90 = vector.shape_cast %89 : vector<1x8x1xf32> to vector<8x1xf32>
    %cst_57 = arith.constant dense<0xFF800000> : vector<8xf32>
    %91 = vector.multi_reduction <maximumf>, %88, %cst_57 [1] : vector<8x8xf32> to vector<8xf32>
    %92 = vector.shape_cast %91 : vector<8xf32> to vector<8x1xf32>
    %93 = arith.maximumf %90, %92 : vector<8x1xf32>
    %94 = arith.subf %90, %93 : vector<8x1xf32>
    %95 = math.exp %94 : vector<8x1xf32>
    %96 = vector.broadcast %93 : vector<8x1xf32> to vector<8x8xf32>
    %97 = arith.subf %88, %96 : vector<8x8xf32>
    %98 = math.exp %97 : vector<8x8xf32>
    %c2_58 = arith.constant 2 : index
    %c0_59 = arith.constant 0 : index
    %c0_60 = arith.constant 0 : index
    %99 = vector.load %arg9[%c2_58, %c0_59, %c0_60] : memref<4x8x1xf32, #tpu.memory_space<vmem>>, vector<1x8x1xf32>
    %100 = vector.shape_cast %99 : vector<1x8x1xf32> to vector<8x1xf32>
    %101 = arith.mulf %95, %100 : vector<8x1xf32>
    %cst_61 = arith.constant dense<0.000000e+00> : vector<8xf32>
    %102 = vector.multi_reduction <add>, %98, %cst_61 [1] : vector<8x8xf32> to vector<8xf32>
    %103 = vector.shape_cast %102 : vector<8xf32> to vector<8x1xf32>
    %104 = arith.addf %101, %103 : vector<8x1xf32>
    %c2_62 = arith.constant 2 : index
    %c0_63 = arith.constant 0 : index
    %c0_64 = arith.constant 0 : index
    %105 = vector.load %arg9[%c2_62, %c0_63, %c0_64] : memref<4x8x1xf32, #tpu.memory_space<vmem>>, vector<1x8x1xf32>
    %106 = vector.shape_cast %105 : vector<1x8x1xf32> to vector<8x1xf32>
    %107 = vector.shape_cast %104 : vector<8x1xf32> to vector<1x8x1xf32>
    tpu.vector_store %arg9[%c2_62, %c0_63, %c0_64], %107 {strides = array<i32>} : memref<4x8x1xf32, #tpu.memory_space<vmem>>, vector<1x8x1xf32>,
    %c2_65 = arith.constant 2 : index
    %c0_66 = arith.constant 0 : index
    %c0_67 = arith.constant 0 : index
    %108 = vector.load %arg10[%c2_65, %c0_66, %c0_67] : memref<4x8x8xf32, #tpu.memory_space<vmem>>, vector<1x8x8xf32>
    %109 = vector.shape_cast %108 : vector<1x8x8xf32> to vector<8x8xf32>
    %110 = vector.broadcast %95 : vector<8x1xf32> to vector<8x8xf32>
    %111 = arith.mulf %110, %109 : vector<8x8xf32>
    %cst_68 = arith.constant dense<0.000000e+00> : vector<8x8xf32>
    %112 = tpu.matmul %98, %87, %cst_68 {dimension_numbers = #tpu.dot_dimension_numbers<[1], [0], [0], [1], [0, 0, 1, 1], [], []>} : vector<8x8xf32>, vector<8x8xf32>, vector<8x8xf32> -> vector<8x8xf32>
    %113 = arith.addf %111, %112 : vector<8x8xf32>
    %c2_69 = arith.constant 2 : index
    %c0_70 = arith.constant 0 : index
    %c0_71 = arith.constant 0 : index
    %114 = vector.load %arg10[%c2_69, %c0_70, %c0_71] : memref<4x8x8xf32, #tpu.memory_space<vmem>>, vector<1x8x8xf32>
    %115 = vector.shape_cast %114 : vector<1x8x8xf32> to vector<8x8xf32>
    %116 = vector.shape_cast %113 : vector<8x8xf32> to vector<1x8x8xf32>
    tpu.vector_store %arg10[%c2_69, %c0_70, %c0_71], %116 {strides = array<i32>} : memref<4x8x8xf32, #tpu.memory_space<vmem>>, vector<1x8x8xf32>,
    %c2_72 = arith.constant 2 : index
    %c0_73 = arith.constant 0 : index
    %c0_74 = arith.constant 0 : index
    %117 = vector.load %arg8[%c2_72, %c0_73, %c0_74] : memref<4x8x1xf32, #tpu.memory_space<vmem>>, vector<1x8x1xf32>
    %118 = vector.shape_cast %117 : vector<1x8x1xf32> to vector<8x1xf32>
    %119 = vector.shape_cast %93 : vector<8x1xf32> to vector<1x8x1xf32>
    tpu.vector_store %arg8[%c2_72, %c0_73, %c0_74], %119 {strides = array<i32>} : memref<4x8x1xf32, #tpu.memory_space<vmem>>, vector<1x8x1xf32>,
    %120 = vector.extract_strided_slice %4 {offsets = [0, 24], sizes = [8, 8], strides = [1, 1]} : vector<8x32xf32> to vector<8x8xf32>
    %cst_75 = arith.constant 0.353553385 : f32
    %121 = vector.broadcast %cst_75 : f32 to vector<8x8xf32>
    %122 = arith.mulf %120, %121 : vector<8x8xf32>
    %123 = vector.extract_strided_slice %6 {offsets = [0, 24], sizes = [8, 8], strides = [1, 1]} : vector<8x32xf32> to vector<8x8xf32>
    %124 = vector.extract_strided_slice %8 {offsets = [0, 24], sizes = [8, 8], strides = [1, 1]} : vector<8x32xf32> to vector<8x8xf32>
    %cst_76 = arith.constant dense<0.000000e+00> : vector<8x8xf32>
    %125 = tpu.matmul %122, %123, %cst_76 {dimension_numbers = #tpu.dot_dimension_numbers<[1], [1], [0], [0], [0, 0, 1, 0], [], []>} : vector<8x8xf32>, vector<8x8xf32>, vector<8x8xf32> -> vector<8x8xf32>
    %c3 = arith.constant 3 : index
    %c0_77 = arith.constant 0 : index
    %c0_78 = arith.constant 0 : index
    %126 = vector.load %arg8[%c3, %c0_77, %c0_78] : memref<4x8x1xf32, #tpu.memory_space<vmem>>, vector<1x8x1xf32>
    %127 = vector.shape_cast %126 : vector<1x8x1xf32> to vector<8x1xf32>
    %cst_79 = arith.constant dense<0xFF800000> : vector<8xf32>
    %128 = vector.multi_reduction <maximumf>, %125, %cst_79 [1] : vector<8x8xf32> to vector<8xf32>
    %129 = vector.shape_cast %128 : vector<8xf32> to vector<8x1xf32>
    %130 = arith.maximumf %127, %129 : vector<8x1xf32>
    %131 = arith.subf %127, %130 : vector<8x1xf32>
    %132 = math.exp %131 : vector<8x1xf32>
    %133 = vector.broadcast %130 : vector<8x1xf32> to vector<8x8xf32>
    %134 = arith.subf %125, %133 : vector<8x8xf32>
    %135 = math.exp %134 : vector<8x8xf32>
    %c3_80 = arith.constant 3 : index
    %c0_81 = arith.constant 0 : index
    %c0_82 = arith.constant 0 : index
    %136 = vector.load %arg9[%c3_80, %c0_81, %c0_82] : memref<4x8x1xf32, #tpu.memory_space<vmem>>, vector<1x8x1xf32>
    %137 = vector.shape_cast %136 : vector<1x8x1xf32> to vector<8x1xf32>
    %138 = arith.mulf %132, %137 : vector<8x1xf32>
    %cst_83 = arith.constant dense<0.000000e+00> : vector<8xf32>
    %139 = vector.multi_reduction <add>, %135, %cst_83 [1] : vector<8x8xf32> to vector<8xf32>
    %140 = vector.shape_cast %139 : vector<8xf32> to vector<8x1xf32>
    %141 = arith.addf %138, %140 : vector<8x1xf32>
    %c3_84 = arith.constant 3 : index
    %c0_85 = arith.constant 0 : index
    %c0_86 = arith.constant 0 : index
    %142 = vector.load %arg9[%c3_84, %c0_85, %c0_86] : memref<4x8x1xf32, #tpu.memory_space<vmem>>, vector<1x8x1xf32>
    %143 = vector.shape_cast %142 : vector<1x8x1xf32> to vector<8x1xf32>
    %144 = vector.shape_cast %141 : vector<8x1xf32> to vector<1x8x1xf32>
    tpu.vector_store %arg9[%c3_84, %c0_85, %c0_86], %144 {strides = array<i32>} : memref<4x8x1xf32, #tpu.memory_space<vmem>>, vector<1x8x1xf32>,
    %c3_87 = arith.constant 3 : index
    %c0_88 = arith.constant 0 : index
    %c0_89 = arith.constant 0 : index
    %145 = vector.load %arg10[%c3_87, %c0_88, %c0_89] : memref<4x8x8xf32, #tpu.memory_space<vmem>>, vector<1x8x8xf32>
    %146 = vector.shape_cast %145 : vector<1x8x8xf32> to vector<8x8xf32>
    %147 = vector.broadcast %132 : vector<8x1xf32> to vector<8x8xf32>
    %148 = arith.mulf %147, %146 : vector<8x8xf32>
    %cst_90 = arith.constant dense<0.000000e+00> : vector<8x8xf32>
    %149 = tpu.matmul %135, %124, %cst_90 {dimension_numbers = #tpu.dot_dimension_numbers<[1], [0], [0], [1], [0, 0, 1, 1], [], []>} : vector<8x8xf32>, vector<8x8xf32>, vector<8x8xf32> -> vector<8x8xf32>
    %150 = arith.addf %148, %149 : vector<8x8xf32>
    %c3_91 = arith.constant 3 : index
    %c0_92 = arith.constant 0 : index
    %c0_93 = arith.constant 0 : index
    %151 = vector.load %arg10[%c3_91, %c0_92, %c0_93] : memref<4x8x8xf32, #tpu.memory_space<vmem>>, vector<1x8x8xf32>
    %152 = vector.shape_cast %151 : vector<1x8x8xf32> to vector<8x8xf32>
    %153 = vector.shape_cast %150 : vector<8x8xf32> to vector<1x8x8xf32>
    tpu.vector_store %arg10[%c3_91, %c0_92, %c0_93], %153 {strides = array<i32>} : memref<4x8x8xf32, #tpu.memory_space<vmem>>, vector<1x8x8xf32>,
    %c3_94 = arith.constant 3 : index
    %c0_95 = arith.constant 0 : index
    %c0_96 = arith.constant 0 : index
    %154 = vector.load %arg8[%c3_94, %c0_95, %c0_96] : memref<4x8x1xf32, #tpu.memory_space<vmem>>, vector<1x8x1xf32>
    %155 = vector.shape_cast %154 : vector<1x8x1xf32> to vector<8x1xf32>
    %156 = vector.shape_cast %130 : vector<8x1xf32> to vector<1x8x1xf32>
    tpu.vector_store %arg8[%c3_94, %c0_95, %c0_96], %156 {strides = array<i32>} : memref<4x8x1xf32, #tpu.memory_space<vmem>>, vector<1x8x1xf32>,
    %c0_i32_97 = arith.constant 0 : i32
    %157 = arith.cmpi eq, %arg3, %c0_i32_97 : i32
    %158 = arith.extui %157 : i1 to i32
    %c0_i32_98 = arith.constant 0 : i32
    %159 = arith.cmpi ne, %158, %c0_i32_98 : i32
    scf.if %159 {
      %c0_99 = arith.constant 0 : index
      %c0_100 = arith.constant 0 : index
      %c0_101 = arith.constant 0 : index
      %160 = vector.load %arg10[%c0_99, %c0_100, %c0_101] : memref<4x8x8xf32, #tpu.memory_space<vmem>>, vector<1x8x8xf32>
      %161 = vector.shape_cast %160 : vector<1x8x8xf32> to vector<8x8xf32>
      %c0_102 = arith.constant 0 : index
      %c0_103 = arith.constant 0 : index
      %c0_104 = arith.constant 0 : index
      %162 = vector.load %arg9[%c0_102, %c0_103, %c0_104] : memref<4x8x1xf32, #tpu.memory_space<vmem>>, vector<1x8x1xf32>
      %163 = vector.shape_cast %162 : vector<1x8x1xf32> to vector<8x1xf32>
      %164 = vector.broadcast %163 : vector<8x1xf32> to vector<8x8xf32>
      %165 = arith.divf %161, %164 : vector<8x8xf32>
      %c0_105 = arith.constant 0 : index
      %c0_106 = arith.constant 0 : index
      %c0_107 = arith.constant 0 : index
      %166 = vector.load %arg7[%c0_105, %c0_106, %c0_107] : memref<1x8x32xf32, #tpu.memory_space<vmem>>, vector<1x8x8xf32>
      %167 = vector.shape_cast %166 : vector<1x8x8xf32> to vector<8x8xf32>
      %168 = vector.shape_cast %165 : vector<8x8xf32> to vector<1x8x8xf32>
      tpu.vector_store %arg7[%c0_105, %c0_106, %c0_107], %168 {strides = array<i32>} : memref<1x8x32xf32, #tpu.memory_space<vmem>>, vector<1x8x8xf32>,
      %c1_108 = arith.constant 1 : index
      %c0_109 = arith.constant 0 : index
      %c0_110 = arith.constant 0 : index
      %169 = vector.load %arg10[%c1_108, %c0_109, %c0_110] : memref<4x8x8xf32, #tpu.memory_space<vmem>>, vector<1x8x8xf32>
      %170 = vector.shape_cast %169 : vector<1x8x8xf32> to vector<8x8xf32>
      %c1_111 = arith.constant 1 : index
      %c0_112 = arith.constant 0 : index
      %c0_113 = arith.constant 0 : index
      %171 = vector.load %arg9[%c1_111, %c0_112, %c0_113] : memref<4x8x1xf32, #tpu.memory_space<vmem>>, vector<1x8x1xf32>
      %172 = vector.shape_cast %171 : vector<1x8x1xf32> to vector<8x1xf32>
      %173 = vector.broadcast %172 : vector<8x1xf32> to vector<8x8xf32>
      %174 = arith.divf %170, %173 : vector<8x8xf32>
      %c0_114 = arith.constant 0 : index
      %c0_115 = arith.constant 0 : index
      %c8 = arith.constant 8 : index
      %175 = vector.load %arg7[%c0_114, %c0_115, %c8] : memref<1x8x32xf32, #tpu.memory_space<vmem>>, vector<1x8x8xf32>
      %176 = vector.shape_cast %175 : vector<1x8x8xf32> to vector<8x8xf32>
      %177 = vector.shape_cast %174 : vector<8x8xf32> to vector<1x8x8xf32>
      tpu.vector_store %arg7[%c0_114, %c0_115, %c8], %177 {strides = array<i32>} : memref<1x8x32xf32, #tpu.memory_space<vmem>>, vector<1x8x8xf32>,
      %c2_116 = arith.constant 2 : index
      %c0_117 = arith.constant 0 : index
      %c0_118 = arith.constant 0 : index
      %178 = vector.load %arg10[%c2_116, %c0_117, %c0_118] : memref<4x8x8xf32, #tpu.memory_space<vmem>>, vector<1x8x8xf32>
      %179 = vector.shape_cast %178 : vector<1x8x8xf32> to vector<8x8xf32>
      %c2_119 = arith.constant 2 : index
      %c0_120 = arith.constant 0 : index
      %c0_121 = arith.constant 0 : index
      %180 = vector.load %arg9[%c2_119, %c0_120, %c0_121] : memref<4x8x1xf32, #tpu.memory_space<vmem>>, vector<1x8x1xf32>
      %181 = vector.shape_cast %180 : vector<1x8x1xf32> to vector<8x1xf32>
      %182 = vector.broadcast %181 : vector<8x1xf32> to vector<8x8xf32>
      %183 = arith.divf %179, %182 : vector<8x8xf32>
      %c0_122 = arith.constant 0 : index
      %c0_123 = arith.constant 0 : index
      %c16 = arith.constant 16 : index
      %184 = vector.load %arg7[%c0_122, %c0_123, %c16] : memref<1x8x32xf32, #tpu.memory_space<vmem>>, vector<1x8x8xf32>
      %185 = vector.shape_cast %184 : vector<1x8x8xf32> to vector<8x8xf32>
      %186 = vector.shape_cast %183 : vector<8x8xf32> to vector<1x8x8xf32>
      tpu.vector_store %arg7[%c0_122, %c0_123, %c16], %186 {strides = array<i32>} : memref<1x8x32xf32, #tpu.memory_space<vmem>>, vector<1x8x8xf32>,
      %c3_124 = arith.constant 3 : index
      %c0_125 = arith.constant 0 : index
      %c0_126 = arith.constant 0 : index
      %187 = vector.load %arg10[%c3_124, %c0_125, %c0_126] : memref<4x8x8xf32, #tpu.memory_space<vmem>>, vector<1x8x8xf32>
      %188 = vector.shape_cast %187 : vector<1x8x8xf32> to vector<8x8xf32>
      %c3_127 = arith.constant 3 : index
      %c0_128 = arith.constant 0 : index
      %c0_129 = arith.constant 0 : index
      %189 = vector.load %arg9[%c3_127, %c0_128, %c0_129] : memref<4x8x1xf32, #tpu.memory_space<vmem>>, vector<1x8x1xf32>
      %190 = vector.shape_cast %189 : vector<1x8x1xf32> to vector<8x1xf32>
      %191 = vector.broadcast %190 : vector<8x1xf32> to vector<8x8xf32>
      %192 = arith.divf %188, %191 : vector<8x8xf32>
      %c0_130 = arith.constant 0 : index
      %c0_131 = arith.constant 0 : index
      %c24 = arith.constant 24 : index
      %193 = vector.load %arg7[%c0_130, %c0_131, %c24] : memref<1x8x32xf32, #tpu.memory_space<vmem>>, vector<1x8x8xf32>
      %194 = vector.shape_cast %193 : vector<1x8x8xf32> to vector<8x8xf32>
      %195 = vector.shape_cast %192 : vector<8x8xf32> to vector<1x8x8xf32>
      tpu.vector_store %arg7[%c0_130, %c0_131, %c24], %195 {strides = array<i32>} : memref<1x8x32xf32, #tpu.memory_space<vmem>>, vector<1x8x8xf32>,
    } else {
    }
    return
  }
  func.func @transform_0(%arg0: i32, %arg1: i32, %arg2: i32, %arg3: i32) -> (i32, i32, i32) {
    %c0_i32 = arith.constant 0 : i32
    return %arg0, %arg2, %arg1 : i32, i32, i32
  }
  func.func @transform_1(%arg0: i32, %arg1: i32, %arg2: i32, %arg3: i32) -> (i32, i32, i32) {
    %c0_i32 = arith.constant 0 : i32
    return %arg0, %arg3, %arg1 : i32, i32, i32
  }
  func.func @transform_2(%arg0: i32, %arg1: i32, %arg2: i32, %arg3: i32) -> (i32, i32, i32) {
    %c0_i32 = arith.constant 0 : i32
    return %arg0, %arg3, %arg1 : i32, i32, i32
  }
  func.func @transform_3(%arg0: i32, %arg1: i32, %arg2: i32, %arg3: i32) -> (i32, i32, i32) {
    %c0_i32 = arith.constant 0 : i32
    return %arg0, %arg2, %arg1 : i32, i32, i32
  }
}

</mosaic_0001>

<bundles_post_ra>
// kernel: tpu_custom_call.1
= control target key start
LH: loop header
LB: loop body
LE: loop exit
PB: predicated region body
PF: predicated region fallthrough
CT: control target
= control target key end

     0   :  { %s1549_s0 = inlined_call_operand.hbm [shape: f32[2,8,32], index: 0, kind: input, shape index: {}]   ;;  %s1550_s1 = inlined_call_operand.hbm [shape: f32[2,8,32], index: 1, kind: input, shape index: {}]   ;;  %s1551_s2 = inlined_call_operand.hbm [shape: f32[2,8,32], index: 2, kind: input, shape index: {}]   ;;  %s1552_s3 = inlined_call_operand.hbm [shape: f32[2,8,32], index: 3, kind: output, shape index: {}]  }
   0x1   :  { %1555 = sst [smem:[#allocation18_spill]] %s1550_s1 }
   0x2   :  { %8 = vsyncpa [#allocation6], 0 }
   0x3   :  { %10 = vsyncpa [#allocation6 + $0x1], 0 }
   0x4   :  { %11 = vsyncpa [#allocation9], 0 }
   0x5   :  { %13 = vsyncpa [#allocation9 + $0x1], 0 }
   0x6   :  { %14 = vsyncpa [#allocation7], 0 }
   0x7   :  { %16 = vsyncpa [#allocation7 + $0x1], 0  ;;  %s1297_s12 = smov 0   ;;  %s1299_s13 = smov 0  }
   0x8   :  { %s1301_s14 = smov 0   ;;  %s1303_s15 = smov 0  }
   0x9   :  { %s1305_s16 = smov 0   ;;  %s1307_s17 = smov 0  }
   0xa LB: > { %1556 = sst [smem:[#allocation15_spill]] %s1262_s16  ;;  %s1328_s18 = sadd.s32 4294967295, %s1266_s17   ;;  %s1266_s17 = sphi %s1307_s17, %s22_s17   ;;  %s1262_s16 = sphi %s1305_s16, %s1568_s16   ;;  %s1258_s15 = sphi %s1303_s15, %s1567_s15   ;;  %s1254_s14 = sphi %s1301_s14, %s1571_s14   ;;  %s1250_s13 = sphi %s1299_s13, %s1570_s13   ;;  %s1246_s12 = sphi %s1297_s12, %s1569_s12  }
   0xb   : > { %s952_s19 = sadd.s32 4294967294, %s1266_s17   ;;  %s48_s20 = sadd.s32 1, %s1262_s16 }
   0xc   : > { %s59_s21 = sadd.s32 1, %s1254_s14  ;;  %p50_p0 = scmp.ge.s32.totalorder %s48_s20, 2 }
   0xd   : > { %p66_p1 = scmp.ne.s32.totalorder %s1254_s14, %s1250_s13  ;;  %p67_p2 = scmp.eq.s32.totalorder %s1266_s17, 0 }
   0xe   : > { %p72_p3 = scmp.ne.s32.totalorder %s1250_s13, %s1246_s12  ;;  %s1573_s20 = smov (%p50_p0, %s48_s20), 0 }
   0xf   : > { %1557 = sst [smem:[#allocation16_spill]] %s1573_s20  ;;  %p1340_p4 = por %p67_p2, %p66_p1 }
  0x10   : > { %p73_p5 = scmp.eq.s32.totalorder %s1328_s18, 0  ;;  %s52_s23 = ssub.s32 %s1262_s16, %s1573_s20 }
  0x11   : > { %p160_p6 = scmp.eq.s32.totalorder %s1328_s18, 1  ;;  %p57_p7 = scmp.eq.s32.totalorder %s52_s23, 0 }
  0x12   : > { %p1348_p8 = por %p73_p5, %p72_p3  ;;  %p166_p10 = scmp.eq.s32.totalorder %s952_s19, 1 }
  0x13   : > { %p1352_p9 = por %p160_p6, %p66_p1  ;;  %p954_p12 = scmp.ge.s32.totalorder %s1266_s17, 2 }
  0x14   : > { %s1357_s26 = scalar_select %p57_p7, %s1254_s14, %s59_s21  }
  0x15   : > { %p1359_p11 = por %p166_p10, %p72_p3  ;;  %p1004_p13 = scmp.lt.s32.totalorder %s1266_s17, 2 }
  0x16   : > { %1561 = sst [smem:[#allocation17_spill]] %s1357_s26  ;;  %s186_s28 = sand.u32 1, %s1254_s14  }
  0x17   : > { %s955_s29 = sshll.u32 %s186_s28, 3  ;;  %s956_s30 = sshll.u32 %s1262_s16, 3 }
  0x18   : > { %p1369_p0 = pnand %p1004_p13, %p1340_p4  ;;  %s207_s5 = sand.u32 1, %s1266_s17  }
  0x19   : > { %s1564_s1 = sld [smem:[#allocation18_spill]]  ;;  %s211_s10 = scalar_lea.vmem [#allocation8], %s955_s29 }
  0x1a   : > { %s221_s11 = sshll.u32 %s211_s10, 4  ;;  %s208_s19 = scalar_lea.sflag [#allocation9], %s207_s5  ;;  %s222_s11 = int_to_ptr.vmem [resolvable:$true] %s221_s11 }
  0x1b   : > { %p961_p1 = scmp.ge.s32.totalorder %s1266_s17, 1  ;;  %p247_p2 = scmp.lt.s32.totalorder %s1266_s17, 3 }
  0x1c   : > { %s196_s6 = scalar_lea.hbm %s1549_s0, %s956_s30  ;;  %s187_s10 = scalar_lea.sflag [#allocation6], %s186_s28 }
  0x1d   : > { %p1381_p3 = pnand %p961_p1, %p247_p2  ;;  %s198_s7 = sshll.u32 %s196_s6, 4  ;;  %s199_s7 = int_to_ptr.hbm [resolvable:$true] %s198_s7 }
  0x1e   : > { %s232_s16 = scalar_lea.vmem [#allocation10], %s955_s29  ;;  %s1398_s22 = sand.u32 (!%p1381_p3), 1, %s1250_s13  }
  0x1f   : > { %s217_s8 = scalar_lea.hbm %s1564_s1, %s956_s30  ;;  %s242_s26 = sshll.u32 %s232_s16, 4  ;;  %s243_s26 = int_to_ptr.vmem [resolvable:$true] %s242_s26 }
  0x20   : > { %s219_s9 = sshll.u32 %s217_s8, 4  ;;  %s190_s8 = scalar_lea.vmem [#allocation5], %s955_s29  ;;  %s220_s9 = int_to_ptr.hbm [resolvable:$true] %s219_s9 }
  0x21   : > { %996 = dma.hbm_to_vmem [thread:$0]  (!%p1369_p0), %s220_s9, 128, %s222_s11, %s208_s19  }
  0x22   : > { %s200_s1 = sshll.u32 %s190_s8, 4  ;;  %s238_s11 = scalar_lea.hbm %s1551_s2, %s956_s30  ;;  %s201_s1 = int_to_ptr.vmem [resolvable:$true] %s200_s1 }
  0x23   : > { %993 = dma.hbm_to_vmem [thread:$0]  (!%p1369_p0), %s199_s7, 128, %s201_s1, %s187_s10  }
  0x24   : > { %s240_s20 = sshll.u32 %s238_s11, 4  ;;  %251 = sbr.rel (%p1381_p3) target bundleno = 1131 (0x46b), region = 32  ;;  %s241_s20 = int_to_ptr.hbm [resolvable:$true] %s240_s20 }
  0x25   : > { %999 = dma.hbm_to_vmem [thread:$0]  (!%p1369_p0), %s241_s20, 128, %s243_s26, %s208_s19  }
  0x26   : > { %s1401_s1 = sshll.u32 (!%p1381_p3), %s1398_s22, 3  ;;  %s254_s28 = scalar_lea.sflag (!%p1381_p3), [#allocation6], %s1398_s22 }
  0x27   : > { %s257_s30 = scalar_lea.vmem (!%p1381_p3), [#allocation5], %s1401_s1 }
  0x29   : > { %1233 = dma.done.wait (%p1348_p8), %s254_s28, 128  }
  0x2a   : > { %1235 = vsyncadd (%p1348_p8), %s254_s28, 4294967168  ;;  %s263_s16 = sand.u32 1, %s1328_s18   ;;  %s267_s26 = scalar_lea.vmem [#allocation8], %s1401_s1 }
  0x2b   : > { %s264_s20 = scalar_lea.sflag [#allocation9], %s263_s16 }
  0x2c   : > { %1237 = dma.done.wait (%p1348_p8), %s264_s20, 256  }
  0x2d   : > { %1239 = vsyncadd (%p1348_p8), %s264_s20, 4294967040  ;;  %vm324_vm0 = vcmask 64512   ;;  %v330_v0 = vld [vmem:[%s267_s26] sm:$0xff]  ;;  %v329_v1 = vld [vmem:[%s257_s30] sm:$0xff]  ;;  %s1268_s29 = smov 120   ;;  %s1269_s4 = smov 112  }
  0x2e   : > { %966 = vmatpush.xpose.msk.msra.mxu0 %vm324_vm0, %v330_v0  ;;  %v332_v2 = vmul.f32 0.35355338, %v329_v1  ;;  %419 = vrot.lane.b32.xlu1 %v330_v0, %s1268_s29  ;;  %s1270_s18 = smov 104   ;;  %vm315_vm1 = vcmask 7168   ;;  %v1271_v3 = vmov -inf   ;;  %v1272_v6 = vmov 0  }
  0x2f   : > { %510 = vrot.lane.b32.xlu2 %v330_v0, %s1269_s4  ;;  %316 = vst.msk [vmem:[#allocation2] sm:$0xff] %vm315_vm1, %v1271_v3  ;;  %1063 = vset.pattern.permute.xlu0 %v1272_v6  ;;  %v1273_v7 = vmov 0.0   ;;  %s277_s24 = scalar_lea.vmem [#allocation10], %s1401_s1  ;;  %s1274_s19 = smov 8  }
  0x30   : > { %317 = vst.msk [vmem:[#allocation2 + $0x8] sm:$0xff] %vm315_vm1, %v1271_v3  ;;  %1064 = vset.pattern.permute.xlu2 %v1272_v6  ;;  %1065 = vset.pattern.permute.xlu1 %v1272_v6  ;;  %v1430_v10 = vld [vmem:[%s277_s24] sm:$0xff]  ;;  %s1503_s21 = scalar_lea.vmem [#allocation11], %s1401_s1  ;;  %s1275_s23 = smov 24  }
  0x31   : > { %967 = vmatmul.msk.f32.vlgmr.msra.gmra.mxu0 %vm324_vm0, %v332_v2  ;;  %318 = vst.msk [vmem:[#allocation2 + $0x10] sm:$0xff] %vm315_vm1, %v1271_v3  ;;  %409 = vmatpush.msra.mxu1 %v1430_v10  ;;  %s1276_s6 = smov 16   ;;  %s979_s7 = sshll.u32 %s1258_s15, 3 }
  0x32   : > { %319 = vst.msk [vmem:[#allocation2 + $0x18] sm:$0xff] %vm315_vm1, %v1271_v3  ;;  %s811_s5 = scalar_lea.hbm %s1552_s3, %s979_s7  ;;  %s813_s9 = sshll.u32 %s1503_s21, 4  ;;  %s814_s9 = int_to_ptr.vmem [resolvable:$true] %s813_s9 }
  0x33   : > { %321 = vst.msk [vmem:[#allocation3 + $0x8] sm:$0xff] %vm315_vm1, %v1273_v7  ;;  %s815_s11 = sshll.u32 %s811_s5, 4  ;;  %s799_s1 = scalar_lea.sflag [#allocation7], %s1398_s22  ;;  %s816_s11 = int_to_ptr.hbm [resolvable:$true] %s815_s11 }
  0x34   : > { %320 = vst.msk [vmem:[#allocation3] sm:$0xff] %vm315_vm1, %v1273_v7  ;;  %s1194_s28 = sshra.s32 %s816_s11, 4  ;;  %s1200_s20 = scalar_lea.hbm %s1552_s3, 16  ;;  %s1195_s28 = int_to_ptr.hbm [resolvable:$true] %s1194_s28 }
  0x35   : > { %322 = vst.msk [vmem:[#allocation3 + $0x10] sm:$0xff] %vm315_vm1, %v1273_v7  ;;  %s1196_s30 = scalar_lea.hbm %s1195_s28, 8  ;;  %p1201_p7 = scmp.lt.s32.totalorder %s1195_s28, %s1552_s3 }
  0x36   : > { %417 = vrot.lane.b32.xlu1 %v332_v2, %s1268_s29  ;;  %323 = vst.msk [vmem:[#allocation3 + $0x18] sm:$0xff] %vm315_vm1, %v1273_v7  ;;  %v1445_v14 = vld [vmem:[#allocation2] sm:$0xff]  ;;  %p1197_p4 = scmp.ne.s32.totalorder %s1195_s28, %s1196_s30  ;;  %p1202_p8 = scmp.lt.s32.totalorder %s1200_s20, %s1196_s30 }
  0x37   : > { %600 = vrot.lane.b32.xlu2 %v330_v0, %s1270_s18  ;;  %325 = vst.msk [vmem:[#allocation4] sm:$0xff] %vm324_vm0, %v1273_v7  ;;  %v446_v28 = vld [vmem:[#allocation2 + $0x8] sm:$0xff] }
  0x38   : > { %326 = vst.msk [vmem:[#allocation4 + $0x8] sm:$0xff] %vm324_vm0, %v1273_v7  ;;  %v537_v39 = vld [vmem:[#allocation2 + $0x10] sm:$0xff]  ;;  %p1198_p5 = pnand %p1197_p4, %p1352_p9  ;;  %p1203_p10 = por %p1202_p8, %p1201_p7 }
  0x39   : > { %327 = vst.msk [vmem:[#allocation4 + $0x10] sm:$0xff] %vm324_vm0, %v1273_v7  ;;  %v1464_v32 = vld [vmem:[#allocation2 + $0x18] sm:$0xff] }
  0x3a   : > { %328 = vst.msk [vmem:[#allocation4 + $0x18] sm:$0xff] %vm324_vm0, %v1273_v7  ;;  %v463_v1 = vld [vmem:[#allocation3 + $0x8] sm:$0xff]  ;;  %p1199_p6 = pneg %p1198_p5 }
  0x3c   : > { %p1204_p13 = pnand %p1203_p10, %p1199_p6 }
  0x3e   : > { %508 = vrot.lane.b32.xlu1 %v332_v2, %s1269_s4 }
  0x3f   : > { %598 = vrot.lane.b32.xlu2 %v332_v2, %s1270_s18 }
  0x89   : > { %v511_v9 = vpop.permute.xlu2 %510 }
  0x8a   : > { %972 = vmatpush.xpose.msk.msrb.mxu1 %vm324_vm0, %v511_v9 }
  0x91   : > { %v601_v12 = vpop.permute.xlu2 %600 }
  0x92   : > { %975 = vmatpush.xpose.msk.msrb.mxu0 %vm324_vm0, %v601_v12 }
  0x99   : > { %v599_v13 = vpop.permute.xlu2 %598 }
  0x9a   : > { %976 = vmatmul.msk.f32.vlgmr.msrb.gmra.mxu0 %vm324_vm0, %v599_v13 }
  0xa0   : > { %v420_v8 = vpop.permute.xlu1 %419 }
  0xa1   : > { %969 = vmatpush.xpose.msk.msra.mxu2 %vm324_vm0, %v420_v8 }
  0xa8   : > { %v418_v11 = vpop.permute.xlu1 %417 }
  0xa9   : > { %970 = vmatmul.msk.f32.vlgmr.msra.gmra.mxu2 %vm324_vm0, %v418_v11 }
  0xae   : > { %v357_v4 = vpop.f32.mrf.mxu0 }
  0xaf   : > { %v361_v5 = vsel %vm324_vm0, %v357_v4, -inf }
  0xb0   : > { %362 = vmax.xlane.f32.xlu0 %v361_v5  ;;  %v509_v26 = vpop.permute.xlu1 %508 }
 0x117   : > { %v623_v21 = vpop.f32.mrf.mxu0 }
 0x118   : > { %v628_v23 = vsel %vm324_vm0, %v623_v21, -inf }
 0x123   : > { %v363_v15 = vpop.xlane.xlu0 %362 }
 0x124   : > { %v1448_v16 = vmax.f32 %v1445_v14, %v363_v15 }
 0x126   : > { %v365_v17 = vsub.f32 %v1445_v14, %v1448_v16  ;;  %416 = vst.msk [vmem:[#allocation2] sm:$0xff] %vm315_vm1, %v1448_v16  ;;  %370 = vperm.xlu0 %1063, %v1448_v16   ;;  %v644_v14 = vld [vmem:[#allocation3 + $0x18] sm:$0xff] }
 0x128   : > { %v366_v5 = vmul.f32 1.442695, %v365_v17 }
 0x12c   : > { %v442_v18 = vpop.f32.mrf.mxu2 }
 0x12d   : > { %v447_v19 = vsel %vm324_vm0, %v442_v18, -inf }
 0x12e   : > { %448 = vmax.xlane.f32.xlu1 %v447_v19 }
 0x150   : > { %629 = vmax.xlane.f32.xlu0 %v628_v23 }
 0x164   : > { %479 = vrot.lane.b32.xlu0 %v1430_v10, %s1268_s29 }
 0x198   : > { %v371_v20 = vpop.permute.xlu0 %370 }
 0x199   : > { %v373_v22 = vsub.f32 %v357_v4, %v371_v20  ;;  %v471_v20 = vld [vmem:[#allocation4 + $0x8] sm:$0xff] }
 0x19b   : > { %v374_v24 = vmul.f32 1.442695, %v373_v22 }
 0x19d   : > { %1066 = vpow2.f32 %v374_v24 }
 0x1a1   : > { %v449_v27 = vpop.xlane.xlu1 %448 }
 0x1a2   : > { %v450_v29 = vmax.f32 %v446_v28, %v449_v27 }
 0x1a3   : > { %v1067_v25 = vpop.eup %1066 }
 0x1a4   : > { %968 = vmatmul.msk.f32.vlgmr.msra.gmra.mxu1 %vm324_vm0, %v1067_v25  ;;  %v451_v30 = vsub.f32 %v446_v28, %v450_v29  ;;  %507 = vst.msk [vmem:[#allocation2 + $0x8] sm:$0xff] %vm315_vm1, %v450_v29  ;;  %v378_v55 = vsel %vm324_vm0, %v1067_v25, 0.0  ;;  %v554_v25 = vld [vmem:[#allocation3 + $0x10] sm:$0xff] }
 0x1a6   : > { %v452_v57 = vmul.f32 1.442695, %v451_v30 }
 0x1ac   : > { %973 = vmatmul.msk.f32.vlgmr.msrb.gmra.mxu1 %vm324_vm0, %v509_v26 }
 0x1c3   : > { %v630_v33 = vpop.xlane.xlu0 %629 }
 0x1c4   : > { %v1467_v34 = vmax.f32 %v1464_v32, %v630_v33 }
 0x1c6   : > { %v632_v35 = vsub.f32 %v1464_v32, %v1467_v34  ;;  %687 = vst.msk [vmem:[#allocation2 + $0x18] sm:$0xff] %vm315_vm1, %v1467_v34 }
 0x1c8   : > { %v633_v7 = vmul.f32 1.442695, %v632_v35 }
 0x1d6   : > { %v480_v38 = vpop.permute.xlu0 %479 }
 0x1d7   : > { %500 = vmatpush.msra.mxu3 %v480_v38  ;;  %v652_v38 = vld [vmem:[#allocation4 + $0x18] sm:$0xff] }
 0x221   : > { %v1462_v31 = vpop.f32.mrf.mxu1 }
 0x229   : > { %v533_v36 = vpop.f32.mrf.mxu1 }
 0x22a   : > { %v538_v37 = vsel %vm324_vm0, %v533_v36, -inf }
 0x22b   : > { %539 = vmax.xlane.f32.xlu2 %v538_v37 }
 0x243   : > { %456 = vperm.xlu2 %1064, %v450_v29   ;;  %v384_v29 = vld [vmem:[#allocation4] sm:$0xff] }
 0x24b   : > { %637 = vperm.xlu2 %1064, %v1467_v34   ;;  %v562_v34 = vld [vmem:[#allocation4 + $0x10] sm:$0xff] }
 0x253   : > { %659 = vrot.lane.b32.xlu2 %v1430_v10, %s1270_s18 }
 0x29e   : > { %v540_v40 = vpop.xlane.xlu2 %539 }
 0x29f   : > { %v541_v41 = vmax.f32 %v537_v39, %v540_v40 }
 0x2a1   : > { %597 = vst.msk [vmem:[#allocation2 + $0x10] sm:$0xff] %vm315_vm1, %v541_v41  ;;  %547 = vperm.xlu1 %1065, %v541_v41   ;;  %v542_v51 = vsub.f32 %v537_v39, %v541_v41 }
 0x2a3   : > { %v543_v53 = vmul.f32 1.442695, %v542_v51 }
 0x2a6   : > { %v457_v42 = vpop.permute.xlu2 %456 }
 0x2a7   : > { %v459_v43 = vsub.f32 %v442_v18, %v457_v42 }
 0x2a9   : > { %v460_v44 = vmul.f32 1.442695, %v459_v43  ;;  %569 = vrot.lane.b32.xlu1 %v1430_v10, %s1269_s4  ;;  %v376_v10 = vld [vmem:[#allocation3] sm:$0xff] }
 0x2ab   : > { %1068 = vpow2.f32 %v460_v44 }
 0x2ae   : > { %v638_v45 = vpop.permute.xlu2 %637 }
 0x2af   : > { %v640_v46 = vsub.f32 %v623_v21, %v638_v45 }
 0x2b1   : > { %v1069_v47 = vpop.eup %1068  ;;  %v641_v48 = vmul.f32 1.442695, %v640_v46 }
 0x2b2   : > { %971 = vmatmul.msk.f32.vlgmr.msra.gmra.mxu3 %vm324_vm0, %v1069_v47  ;;  %v465_v49 = vsel %vm324_vm0, %v1069_v47, 0.0 }
 0x2b3   : > { %1070 = vpow2.f32 %v641_v48  ;;  %466 = vadd.xlane.f32.xlu0 %v465_v49 }
 0x2b4   : > { %1072 = vpow2.f32 %v543_v53 }
 0x2b5   : > { %1074 = vpow2.f32 %v452_v57 }
 0x2b6   : > { %v660_v50 = vpop.permute.xlu2 %659 }
 0x2b7   : > { %680 = vmatpush.msrb.mxu2 %v660_v50 }
 0x2b9   : > { %v1071_v52 = vpop.eup %1070 }
 0x2ba   : > { %977 = vmatmul.msk.f32.vlgmr.msrb.gmra.mxu2 %vm324_vm0, %v1071_v52  ;;  %v1073_v54 = vpop.eup %1072  ;;  %v646_v56 = vsel %vm324_vm0, %v1071_v52, 0.0 }
 0x2bb   : > { %v1075_v58 = vpop.eup %1074  ;;  %v555_v26 = vmul.f32 %v1073_v54, %v554_v25 }
 0x2bc   : > { %v464_v2 = vmul.f32 %v1075_v58, %v463_v1 }
 0x2c7   : > { %565 = vperm.xlu0 %1063, %v1073_v54  }
 0x2d3   : > { %379 = vadd.xlane.f32.xlu1 %v378_v55 }
 0x2db   : > { %647 = vadd.xlane.f32.xlu1 %v646_v56 }
 0x2f4   : > { %474 = vperm.xlu1 %1065, %v1075_v58  }
 0x313   : > { %v548_v59 = vpop.permute.xlu1 %547 }
 0x314   : > { %v550_v60 = vsub.f32 %v533_v36, %v548_v59 }
 0x316   : > { %v551_v61 = vmul.f32 1.442695, %v550_v60 }
 0x318   : > { %1076 = vpow2.f32 %v551_v61 }
 0x319   : > { %1078 = vpow2.f32 %v366_v5 }
 0x31a   : > { %1080 = vpow2.f32 %v633_v7 }
 0x31b   : > { %v570_v62 = vpop.permute.xlu1 %569 }
 0x31c   : > { %590 = vmatpush.msrb.mxu3 %v570_v62 }
 0x31e   : > { %v1077_v63 = vpop.eup %1076 }
 0x31f   : > { %974 = vmatmul.msk.f32.vlgmr.msrb.gmra.mxu3 %vm324_vm0, %v1077_v63  ;;  %v556_v0 = vsel %vm324_vm0, %v1077_v63, 0.0  ;;  %v1079_v8 = vpop.eup %1078 }
 0x320   : > { %557 = vadd.xlane.f32.xlu2 %v556_v0  ;;  %v1081_v9 = vpop.eup %1080  ;;  %v377_v11 = vmul.f32 %v1079_v8, %v376_v10 }
 0x321   : > { %v645_v15 = vmul.f32 %v1081_v9, %v644_v14 }
 0x326   : > { %v467_v3 = vpop.xlane.xlu0 %466 }
 0x327   : > { %v468_v4 = vadd.f32 %v467_v3, %v464_v2 }
 0x329   : > { %469 = vst.msk [vmem:[#allocation3 + $0x8] sm:$0xff] %vm315_vm1, %v468_v4 }
 0x330   : > { %v715_v6 = vld [vmem:[#allocation3 + $0x8] sm:$0xff] }
 0x331   : > { %718 = vperm.xlu1 %1065, %v715_v6  }
 0x335   : > { %v502_v23 = vpop.f32.mrf.mxu3 }
 0x338   : > { %387 = vperm.xlu2 %1064, %v1079_v8  }
 0x339   : > { %v566_v35 = vpop.permute.xlu0 %565 }
 0x33a   : > { %v568_v37 = vmul.f32 %v566_v35, %v562_v34 }
 0x33d   : > { %v682_v44 = vpop.f32.mrf.mxu2 }
 0x340   : > { %655 = vperm.xlu2 %1064, %v1081_v9  }
 0x346   : > { %v380_v12 = vpop.xlane.xlu1 %379 }
 0x347   : > { %v381_v13 = vadd.f32 %v380_v12, %v377_v11 }
 0x349   : > { %383 = vst.msk [vmem:[#allocation3] sm:$0xff] %vm315_vm1, %v381_v13 }
 0x34e   : > { %v648_v16 = vpop.xlane.xlu1 %647 }
 0x34f   : > { %v649_v17 = vadd.f32 %v648_v16, %v645_v15 }
 0x350   : > { %v692_v18 = vld [vmem:[#allocation3] sm:$0xff] }
 0x351   : > { %650 = vst.msk [vmem:[#allocation3 + $0x18] sm:$0xff] %vm315_vm1, %v649_v17  ;;  %695 = vperm.xlu0 %1063, %v692_v18  }
 0x358   : > { %v771_v19 = vld [vmem:[#allocation3 + $0x18] sm:$0xff] }
 0x359   : > { %774 = vperm.xlu0 %1063, %v771_v19  }
 0x366   : > { %v475_v21 = vpop.permute.xlu1 %474 }
 0x367   : > { %v477_v22 = vmul.f32 %v475_v21, %v471_v20 }
 0x369   : > { %v505_v24 = vadd.f32 %v502_v23, %v477_v22 }
 0x36b   : > { %506 = vst.msk [vmem:[#allocation4 + $0x8] sm:$0xff] %vm324_vm0, %v505_v24 }
 0x372   : > { %v714_v54 = vld [vmem:[#allocation4 + $0x8] sm:$0xff] }
 0x393   : > { %v558_v27 = vpop.xlane.xlu2 %557 }
 0x394   : > { %v559_v28 = vadd.f32 %v558_v27, %v555_v26 }
 0x396   : > { %560 = vst.msk [vmem:[#allocation3 + $0x10] sm:$0xff] %vm315_vm1, %v559_v28 }
 0x39b   : > { %v388_v30 = vpop.permute.xlu2 %387 }
 0x39c   : > { %v390_v32 = vmul.f32 %v388_v30, %v384_v29 }
 0x39d   : > { %v743_v33 = vld [vmem:[#allocation3 + $0x10] sm:$0xff] }
 0x39e   : > { %v414_v36 = vadd.f32 %v1462_v31, %v390_v32  ;;  %746 = vperm.xlu2 %1064, %v743_v33  }
 0x3a0   : > { %415 = vst.msk [vmem:[#allocation4] sm:$0xff] %vm324_vm0, %v414_v36 }
 0x3a2   : > { %v592_v39 = vpop.f32.mrf.mxu3 }
 0x3a3   : > { %v595_v40 = vadd.f32 %v592_v39, %v568_v37  ;;  %v719_v41 = vpop.permute.xlu1 %718  ;;  %v656_v42 = vpop.permute.xlu2 %655 }
 0x3a4   : > { %1082 = vrcp.f32 %v719_v41  ;;  %v658_v43 = vmul.f32 %v656_v42, %v652_v38  ;;  %v732_v48 = vand.u32 2147483648, %v719_v41  ;;  %v730_v50 = vand.u32 2147483647, %v719_v41 }
 0x3a5   : > { %596 = vst.msk [vmem:[#allocation4 + $0x10] sm:$0xff] %vm324_vm0, %v595_v40  ;;  %vm726_vm3 = vweird.f32 %v719_v41 }
 0x3a6   : > { %v685_v45 = vadd.f32 %v682_v44, %v658_v43  ;;  %v733_v52 = vor.u32 1.1754944e-38, %v732_v48  ;;  %vm731_vm5 = vcmp.eq.f32.partialorder %v730_v50, 8.507059e+37 }
 0x3a7   : > { %v691_v6 = vld [vmem:[#allocation4] sm:$0xff] }
 0x3a8   : > { %686 = vst.msk [vmem:[#allocation4 + $0x18] sm:$0xff] %vm324_vm0, %v685_v45 }
 0x3aa   : > { %v1083_v46 = vpop.eup %1082 }
 0x3ab   : > { %v722_v47 = vmul.f32 %v1083_v46, %v719_v41  ;;  %vm727_vm2 = vweird.f32 %v1083_v46 }
 0x3ac   : > { %vm728_vm4 = vmor %vm726_vm3, %vm727_vm2  ;;  %v742_v29 = vld [vmem:[#allocation4 + $0x10] sm:$0xff]  ;;  %vm740_vm2 = vcmask 130112   ;;  %vm768_vm3 = vcmask 195712  }
 0x3ad   : > { %v723_v31 = vsub.f32 1.0, %v722_v47 }
 0x3af   : > { %v724_v49 = vmul.f32 %v1083_v46, %v723_v31  ;;  %v770_v16 = vld [vmem:[#allocation4 + $0x18] sm:$0xff] }
 0x3b1   : > { %v725_v51 = vadd.f32 %v1083_v46, %v724_v49 }
 0x3b3   : > { %v729_v53 = vsel %vm728_vm4, %v1083_v46, %v725_v51  ;;  %vm796_vm4 = vcmask 261312  }
 0x3b4   : > { %v734_v55 = vsel %vm731_vm5, %v733_v52, %v729_v53 }
 0x3b5   : > { %v735_v56 = vmul.f32 %v734_v55, %v714_v54 }
 0x3b7   : > { %737 = vrot.lane.b32.xlu1 %v735_v56, %s1274_s19 }
 0x3c3   : > { %v696_v57 = vpop.permute.xlu0 %695 }
 0x3c4   : > { %1084 = vrcp.f32 %v696_v57  ;;  %v709_v62 = vand.u32 2147483648, %v696_v57  ;;  %v707_v0 = vand.u32 2147483647, %v696_v57  ;;  %vm703_vm7 = vweird.f32 %v696_v57 }
 0x3c6   : > { %v710_v3 = vor.u32 1.1754944e-38, %v709_v62  ;;  %vm708_vm9 = vcmp.eq.f32.partialorder %v707_v0, 8.507059e+37 }
 0x3ca   : > { %v1085_v58 = vpop.eup %1084 }
 0x3cb   : > { %v699_v59 = vmul.f32 %v1085_v58, %v696_v57  ;;  %v775_v60 = vpop.permute.xlu0 %774  ;;  %vm704_vm6 = vweird.f32 %v1085_v58 }
 0x3cc   : > { %1086 = vrcp.f32 %v775_v60  ;;  %vm705_vm8 = vmor %vm703_vm7, %vm704_vm6  ;;  %v788_v10 = vand.u32 2147483648, %v775_v60  ;;  %v786_v12 = vand.u32 2147483647, %v775_v60  ;;  %vm782_vm11 = vweird.f32 %v775_v60 }
 0x3cd   : > { %v700_v61 = vsub.f32 1.0, %v699_v59 }
 0x3ce   : > { %v789_v14 = vor.u32 1.1754944e-38, %v788_v10  ;;  %vm787_vm13 = vcmp.eq.f32.partialorder %v786_v12, 8.507059e+37 }
 0x3cf   : > { %v701_v63 = vmul.f32 %v1085_v58, %v700_v61 }
 0x3d1   : > { %v702_v1 = vadd.f32 %v1085_v58, %v701_v63 }
 0x3d2   : > { %v1087_v2 = vpop.eup %1086 }
 0x3d3   : > { %v706_v4 = vsel %vm705_vm8, %v1085_v58, %v702_v1  ;;  %v778_v5 = vmul.f32 %v1087_v2, %v775_v60  ;;  %vm783_vm10 = vweird.f32 %v1087_v2 }
 0x3d4   : > { %v711_v7 = vsel %vm708_vm9, %v710_v3, %v706_v4  ;;  %vm784_vm12 = vmor %vm782_vm11, %vm783_vm10 }
 0x3d5   : > { %v712_v8 = vmul.f32 %v711_v7, %v691_v6  ;;  %v779_v9 = vsub.f32 1.0, %v778_v5 }
 0x3d7   : > { %v780_v11 = vmul.f32 %v1087_v2, %v779_v9  ;;  %713 = vst.msk [vmem:[%s1503_s21] sm:$0xff] %vm324_vm0, %v712_v8 }
 0x3d9   : > { %v781_v13 = vadd.f32 %v1087_v2, %v780_v11 }
 0x3db   : > { %v785_v15 = vsel %vm784_vm12, %v1087_v2, %v781_v13 }
 0x3dc   : > { %v790_v17 = vsel %vm787_vm13, %v789_v14, %v785_v15 }
 0x3dd   : > { %v791_v18 = vmul.f32 %v790_v17, %v770_v16 }
 0x3df   : > { %793 = vrot.lane.b32.xlu0 %v791_v18, %s1275_s23 }
 0x3f8   : > { %v747_v19 = vpop.permute.xlu2 %746 }
 0x3f9   : > { %1088 = vrcp.f32 %v747_v19  ;;  %v760_v23 = vand.u32 2147483648, %v747_v19  ;;  %v758_v25 = vand.u32 2147483647, %v747_v19  ;;  %vm754_vm15 = vweird.f32 %v747_v19 }
 0x3fb   : > { %v761_v27 = vor.u32 1.1754944e-38, %v760_v23  ;;  %vm759_vm1 = vcmp.eq.f32.partialorder %v758_v25, 8.507059e+37 }
 0x3ff   : > { %v1089_v20 = vpop.eup %1088 }
 0x400   : > { %v750_v21 = vmul.f32 %v1089_v20, %v747_v19  ;;  %vm755_vm14 = vweird.f32 %v1089_v20 }
 0x401   : > { %vm756_vm0 = vmor %vm754_vm15, %vm755_vm14 }
 0x402   : > { %v751_v22 = vsub.f32 1.0, %v750_v21 }
 0x404   : > { %v752_v24 = vmul.f32 %v1089_v20, %v751_v22 }
 0x406   : > { %v753_v26 = vadd.f32 %v1089_v20, %v752_v24 }
 0x408   : > { %v757_v28 = vsel %vm756_vm0, %v1089_v20, %v753_v26 }
 0x409   : > { %v762_v30 = vsel %vm759_vm1, %v761_v27, %v757_v28 }
 0x40a   : > { %v763_v32 = vmul.f32 %v762_v30, %v742_v29 }
 0x40c   : > { %765 = vrot.lane.b32.xlu2 %v763_v32, %s1276_s6 }
 0x429   : > { %v738_v33 = vpop.permute.xlu1 %737 }
 0x42a   : > { %741 = vst.msk [vmem:[%s1503_s21] sm:$0xff] %vm740_vm2, %v738_v33 }
 0x451   : > { %v794_v35 = vpop.permute.xlu0 %793 }
 0x466   : > { %v766_v34 = vpop.permute.xlu2 %765 }
 0x467   : > { %769 = vst.msk [vmem:[%s1503_s21] sm:$0xff] %vm768_vm3, %v766_v34 }
 0x468   : > { %797 = vst.msk [vmem:[%s1503_s21] sm:$0xff] %vm796_vm4, %v794_v35 }
 0x469   : > { %1207 = shalt.err (!%p1204_p13)
}
 0x46a   : > { %988 = dma.vmem_to_hbm [thread:$0]  (%p1352_p9), %s814_s9, 128, %s816_s11, %s799_s1  }
 0x46b PF: > { %s827_s22 = sand.u32 1, %s1246_s12   ;;  %p1001_p0 = pnand %p954_p12, %p1359_p11 }
 0x46c   : > { %s828_s4 = scalar_lea.sflag [#allocation7], %s827_s22 }
 0x46d   : > { %p1002_p1 = pneg %p1001_p0 }
 0x46f   : > { %1241 = dma.done.wait (%p1002_p1), %s828_s4, 128  }
 0x470   : > { %1243 = vsyncadd (%p1002_p1), %s828_s4, 4294967168  ;;  %s22_s17 = sadd.s32 1, %s1266_s17   ;;  %s1566_s18 = sld [smem:[#allocation17_spill]] }
 0x471   : > { %p19_p2 = scmp.ge.s32.totalorder %s22_s17, 4   ;;  %s1567_s15 = sld [smem:[#allocation15_spill]] }
 0x472   : > { %s1568_s16 = sld [smem:[#allocation16_spill]]  ;;  %s1569_s12 = smov %s1250_s13 }
 0x473   : > { %s1570_s13 = smov %s1254_s14  ;;  %21 = sbr.rel (!%p19_p2) target bundleno = 10 (0xa), region = 118 }
 0x476   : > { %s1571_s14 = smov %s1566_s18 }
 0x478   :  { %834 = vsyncpa [#allocation6], 1 }
 0x479   :  { %836 = vsyncpa [#allocation6 + $0x1], 1 }
 0x47a   :  { %837 = vsyncpa [#allocation9], 1 }
 0x47b   :  { %839 = vsyncpa [#allocation9 + $0x1], 1 }
 0x47c   :  { %840 = vsyncpa [#allocation7], 1 }
 0x47d   :  { %842 = vsyncpa [#allocation7 + $0x1], 1 }

</bundles_post_ra>
